<compile_context>
chip_gen: v7x
topology: tpu7x:2x2x1
jax: 0.10.0
libtpu: 0.0.40
codegen_flags: <defaults>
</compile_context>

<pallas_src>
import jax
import jax.numpy as jnp
from jax.experimental import pallas as pl
from jax.experimental.pallas import tpu as pltpu


def ca_kernel(x_ref, w123_ref, b123_ref, w4_ref, b4_ref, o_ref):
    x = x_ref[...]                                        # (Nb, C, HW), native dtype
    # Global average pool: sum in f32; the 1/(H*W) factor is folded into w123.
    pooled = jnp.sum(x.astype(jnp.float32), axis=-1)      # (Nb, C)

    # Three parallel BasicBlocks (linear + ReLU), expressed as one stacked dot.
    h = jnp.dot(pooled, w123_ref[...],
                preferred_element_type=jnp.float32) + b123_ref[...]     # (Nb, 3Cr)
    h = jnp.maximum(h, 0.0)

    # concat([c1,c2,c3]) -> c4 (linear + sigmoid), as one dot.
    z = jnp.dot(h, w4_ref[...],
                preferred_element_type=jnp.float32) + b4_ref[...]       # (Nb, C)
    y = jax.nn.sigmoid(z)

    # Channel-wise rescale in native dtype (no f32 copy of x).
    o_ref[...] = (x * y[:, :, None].astype(x.dtype)).astype(o_ref.dtype)


def _pick_batch_block(n, per_image_bytes, budget_bytes):
    """Largest divisor of n whose block fits the per-buffer budget (>=1)."""
    for cand in range(n, 0, -1):
        if n % cand == 0 and cand * per_image_bytes <= budget_bytes:
            return cand
    return 1


def ca_layer(x, params, *, block_budget_bytes=3 << 20):
    """Pallas CALayer forward.  x: (N, C, H, W).  params: full conv weights."""
    N, C, H, W = x.shape
    HW = H * W
    w1, b1, w2, b2, w3, b3, w4, b4 = params
    Cr = w1.shape[0]
    C3 = 3 * Cr

    # Center tap of every 3x3 (dilated) conv = the only tap touching the 1x1
    # pooled input.  Stack the three branch weights, fold in the 1/(H*W) mean.
    inv_hw = jnp.float32(1.0 / float(HW))
    w123 = jnp.concatenate(
        [w1[:, :, 1, 1].T, w2[:, :, 1, 1].T, w3[:, :, 1, 1].T], axis=1
    ).astype(jnp.float32) * inv_hw                                  # (C, 3Cr)
    b123 = jnp.concatenate([b1, b2, b3]).reshape(1, C3).astype(jnp.float32)
    w4t = w4[:, :, 1, 1].T.astype(jnp.float32)                      # (3Cr, C)
    b4r = b4.reshape(1, C).astype(jnp.float32)

    # Lane-dense layout: flatten spatial dims.
    xf = x.reshape(N, C, HW)

    per_image_bytes = C * HW * x.dtype.itemsize
    Nb = _pick_batch_block(N, per_image_bytes, block_budget_bytes)
    grid = (N // Nb,)

    # 2x double-buffering for input + output blocks, plus small weight tiles.
    block_bytes = Nb * per_image_bytes
    vmem_need = 4 * block_bytes + (2 << 20)
    cp_kwargs = dict(dimension_semantics=("parallel",))
    if vmem_need > (16 << 20):                 # beyond the smallest default scoped limit
        cp_kwargs["vmem_limit_bytes"] = int(min(vmem_need, 56 << 20))
    # TODO(synk): for very large H*W (single image block > ~14 MiB) a two-pass
    # HW-tiled pipeline (pool pass + rescale pass) would be needed; whole
    # flattened images per step cover all realistic DRLN patch sizes.

    wspec = lambda shape: pl.BlockSpec(shape, lambda n: (0, 0))

    out = pl.pallas_call(
        ca_kernel,
        out_shape=jax.ShapeDtypeStruct((N, C, HW), x.dtype),
        grid=grid,
        in_specs=[
            pl.BlockSpec((Nb, C, HW), lambda n: (n, 0, 0)),   # x, Nb images / step
            wspec((C, C3)),                                   # stacked branch weights
            wspec((1, C3)),                                   # stacked branch biases
            wspec((C3, C)),                                   # c4 center-tap weight^T
            wspec((1, C)),                                    # c4 bias
        ],
        out_specs=pl.BlockSpec((Nb, C, HW), lambda n: (n, 0, 0)),
        compiler_params=pltpu.CompilerParams(**cp_kwargs),
    )(xf, w123, b123, w4t, b4r)
    return out.reshape(N, C, H, W)


def ca_layer_ref(x, params):
    """Pure-JAX reference using the real dilated convolutions (PyTorch semantics)."""
    w1, b1, w2, b2, w3, b3, w4, b4 = params

    def conv(inp, w, b, pad, dil):
        out = jax.lax.conv_general_dilated(
            inp, w, window_strides=(1, 1),
            padding=[(pad, pad), (pad, pad)],
            rhs_dilation=(dil, dil),
            dimension_numbers=("NCHW", "OIHW", "NCHW"))
        return out + b[None, :, None, None]

    y = jnp.mean(x, axis=(2, 3), keepdims=True)           # AdaptiveAvgPool2d(1)
    c1 = jax.nn.relu(conv(y, w1, b1, 3, 3))
    c2 = jax.nn.relu(conv(y, w2, b2, 5, 5))
    c3 = jax.nn.relu(conv(y, w3, b3, 7, 7))
    cat = jnp.concatenate([c1, c2, c3], axis=1)
    y4 = jax.nn.sigmoid(conv(cat, w4, b4, 1, 1))
    return x * y4


if __name__ == "__main__":
    key = jax.random.PRNGKey(0)
    N, C, H, W = 2, 64, 8, 8          # DRLN uses chs=64
    reduction = 16
    Cr = C // reduction

    ks = jax.random.split(key, 9)
    scale = 0.1
    x = jax.random.normal(ks[0], (N, C, H, W), jnp.float32)
    # Deterministic synthetic parameters (full conv-shaped weights, as in __init__).
    w1 = jax.random.normal(ks[1], (Cr, C, 3, 3), jnp.float32) * scale
    b1 = jax.random.normal(ks[2], (Cr,), jnp.float32) * scale
    w2 = jax.random.normal(ks[3], (Cr, C, 3, 3), jnp.float32) * scale
    b2 = jax.random.normal(ks[4], (Cr,), jnp.float32) * scale
    w3 = jax.random.normal(ks[5], (Cr, C, 3, 3), jnp.float32) * scale
    b3 = jax.random.normal(ks[6], (Cr,), jnp.float32) * scale
    w4 = jax.random.normal(ks[7], (C, 3 * Cr, 3, 3), jnp.float32) * scale
    b4 = jax.random.normal(ks[8], (C,), jnp.float32) * scale
    params = (w1, b1, w2, b2, w3, b3, w4, b4)

    out = jax.block_until_ready(ca_layer(x, params))
    ref = ca_layer_ref(x, params)
    assert out.shape == x.shape and out.dtype == x.dtype
    max_err = float(jnp.max(jnp.abs(out - ref)))
    assert jnp.allclose(out, ref, atol=1e-5, rtol=1e-5), f"max_err={max_err}"
    print("KERNEL_OK")
</pallas_src>

<mosaic_0001>
module attributes {stable_mosaic.version = 11 : i64} {
  func.func @ca_kernel(%arg0: i32, %arg1: memref<2x64x64xf32, #tpu.memory_space<vmem>>, %arg2: memref<64x12xf32, #tpu.memory_space<vmem>>, %arg3: memref<1x12xf32, #tpu.memory_space<vmem>>, %arg4: memref<12x64xf32, #tpu.memory_space<vmem>>, %arg5: memref<1x64xf32, #tpu.memory_space<vmem>>, %arg6: memref<2x64x64xf32, #tpu.memory_space<vmem>>) attributes {dimension_semantics = [#tpu.dimension_semantics<parallel>], iteration_bounds = array<i64: 1>, scalar_prefetch = 0 : i64, scratch_operands = 0 : i64, tpu.core_type = #tpu.core_type<tc>, window_params = [{transform_indices = @transform_0, window_bounds = array<i64: 2, 64, 64>}, {pipeline_mode = #tpu.pipeline_mode<synchronous>, transform_indices = @transform_1, window_bounds = array<i64: 64, 12>}, {pipeline_mode = #tpu.pipeline_mode<synchronous>, transform_indices = @transform_2, window_bounds = array<i64: 1, 12>}, {pipeline_mode = #tpu.pipeline_mode<synchronous>, transform_indices = @transform_3, window_bounds = array<i64: 12, 64>}, {pipeline_mode = #tpu.pipeline_mode<synchronous>, transform_indices = @transform_4, window_bounds = array<i64: 1, 64>}, {transform_indices = @transform_5, window_bounds = array<i64: 2, 64, 64>}]} {
    %c0 = arith.constant 0 : index
    %c0_0 = arith.constant 0 : index
    %c0_1 = arith.constant 0 : index
    %0 = vector.load %arg1[%c0, %c0_0, %c0_1] : memref<2x64x64xf32, #tpu.memory_space<vmem>>, vector<2x64x64xf32>
    %cst = arith.constant dense<0.000000e+00> : vector<2x64xf32>
    %1 = vector.multi_reduction <add>, %0, %cst [2] : vector<2x64x64xf32> to vector<2x64xf32>
    %c0_2 = arith.constant 0 : index
    %c0_3 = arith.constant 0 : index
    %2 = vector.load %arg2[%c0_2, %c0_3] : memref<64x12xf32, #tpu.memory_space<vmem>>, vector<64x12xf32>
    %cst_4 = arith.constant dense<0.000000e+00> : vector<2x12xf32>
    %3 = tpu.matmul %1, %2, %cst_4 {dimension_numbers = #tpu.dot_dimension_numbers<[1], [0], [0], [1], [0, 0, 1, 1], [], []>} : vector<2x64xf32>, vector<64x12xf32>, vector<2x12xf32> -> vector<2x12xf32>
    %c0_5 = arith.constant 0 : index
    %c0_6 = arith.constant 0 : index
    %4 = vector.load %arg3[%c0_5, %c0_6] : memref<1x12xf32, #tpu.memory_space<vmem>>, vector<1x12xf32>
    %5 = vector.broadcast %4 : vector<1x12xf32> to vector<2x12xf32>
    %6 = arith.addf %3, %5 : vector<2x12xf32>
    %cst_7 = arith.constant 0.000000e+00 : f32
    %7 = vector.broadcast %cst_7 : f32 to vector<2x12xf32>
    %8 = arith.maximumf %6, %7 : vector<2x12xf32>
    %c0_8 = arith.constant 0 : index
    %c0_9 = arith.constant 0 : index
    %9 = vector.load %arg4[%c0_8, %c0_9] : memref<12x64xf32, #tpu.memory_space<vmem>>, vector<12x64xf32>
    %cst_10 = arith.constant dense<0.000000e+00> : vector<2x64xf32>
    %10 = tpu.matmul %8, %9, %cst_10 {dimension_numbers = #tpu.dot_dimension_numbers<[1], [0], [0], [1], [0, 0, 1, 1], [], []>} : vector<2x12xf32>, vector<12x64xf32>, vector<2x64xf32> -> vector<2x64xf32>
    %c0_11 = arith.constant 0 : index
    %c0_12 = arith.constant 0 : index
    %11 = vector.load %arg5[%c0_11, %c0_12] : memref<1x64xf32, #tpu.memory_space<vmem>>, vector<1x64xf32>
    %12 = vector.broadcast %11 : vector<1x64xf32> to vector<2x64xf32>
    %13 = arith.addf %10, %12 : vector<2x64xf32>
    %14 = arith.negf %13 : vector<2x64xf32>
    %15 = math.exp %14 : vector<2x64xf32>
    %cst_13 = arith.constant 1.000000e+00 : f32
    %16 = vector.broadcast %cst_13 : f32 to vector<2x64xf32>
    %17 = arith.addf %16, %15 : vector<2x64xf32>
    %18 = arith.divf %16, %17 : vector<2x64xf32>
    %19 = vector.shape_cast %18 : vector<2x64xf32> to vector<2x64x1xf32>
    %20 = vector.broadcast %19 : vector<2x64x1xf32> to vector<2x64x64xf32>
    %21 = arith.mulf %0, %20 : vector<2x64x64xf32>
    %c0_14 = arith.constant 0 : index
    %c0_15 = arith.constant 0 : index
    %c0_16 = arith.constant 0 : index
    %22 = vector.load %arg6[%c0_14, %c0_15, %c0_16] : memref<2x64x64xf32, #tpu.memory_space<vmem>>, vector<2x64x64xf32>
    tpu.vector_store %arg6[%c0_14, %c0_15, %c0_16], %21 {strides = array<i32>} : memref<2x64x64xf32, #tpu.memory_space<vmem>>, vector<2x64x64xf32>,
    return
  }
  func.func @transform_0(%arg0: i32) -> (i32, i32, i32) {
    %c0_i32 = arith.constant 0 : i32
    %c0_i32_0 = arith.constant 0 : i32
    %c0_i32_1 = arith.constant 0 : i32
    return %arg0, %c0_i32, %c0_i32_0 : i32, i32, i32
  }
  func.func @transform_1(%arg0: i32) -> (i32, i32) {
    %c0_i32 = arith.constant 0 : i32
    %c0_i32_0 = arith.constant 0 : i32
    %c0_i32_1 = arith.constant 0 : i32
    return %c0_i32, %c0_i32_0 : i32, i32
  }
  func.func @transform_2(%arg0: i32) -> (i32, i32) {
    %c0_i32 = arith.constant 0 : i32
    %c0_i32_0 = arith.constant 0 : i32
    %c0_i32_1 = arith.constant 0 : i32
    return %c0_i32, %c0_i32_0 : i32, i32
  }
  func.func @transform_3(%arg0: i32) -> (i32, i32) {
    %c0_i32 = arith.constant 0 : i32
    %c0_i32_0 = arith.constant 0 : i32
    %c0_i32_1 = arith.constant 0 : i32
    return %c0_i32, %c0_i32_0 : i32, i32
  }
  func.func @transform_4(%arg0: i32) -> (i32, i32) {
    %c0_i32 = arith.constant 0 : i32
    %c0_i32_0 = arith.constant 0 : i32
    %c0_i32_1 = arith.constant 0 : i32
    return %c0_i32, %c0_i32_0 : i32, i32
  }
  func.func @transform_5(%arg0: i32) -> (i32, i32, i32) {
    %c0_i32 = arith.constant 0 : i32
    %c0_i32_0 = arith.constant 0 : i32
    %c0_i32_1 = arith.constant 0 : i32
    return %arg0, %c0_i32, %c0_i32_0 : i32, i32, i32
  }
}

</mosaic_0001>

<bundles_post_ra>
// kernel: tpu_custom_call.1
= control target key start
LH: loop header
LB: loop body
LE: loop exit
PB: predicated region body
PF: predicated region fallthrough
CT: control target
= control target key end

     0   :  { %10 = vsyncpa [#allocation3], 0  ;;  %s855_s0 = inlined_call_operand.hbm [shape: f32[2,64,64], index: 0, kind: input, shape index: {}]   ;;  %s856_s1 = inlined_call_operand.vmem [shape: f32[64,12], index: 1, kind: input, shape index: {}]   ;;  %s857_s2 = inlined_call_operand.vmem [shape: f32[1,12], index: 2, kind: input, shape index: {}]   ;;  %s858_s3 = inlined_call_operand.vmem [shape: f32[12,64], index: 3, kind: input, shape index: {}]   ;;  %s859_s4 = inlined_call_operand.vmem [shape: f32[1,64], index: 4, kind: input, shape index: {}]   ;;  %s860_s5 = inlined_call_operand.hbm [shape: f32[2,64,64], index: 5, kind: output, shape index: {}]  }
   0x1   :  { %11 = vsyncpa [#allocation4], 0  ;;  %s632_s18 = smov [#allocation2]   ;;  %s584_s22 = scalar_lea.hbm %s855_s0, 2048 }
   0x2   :  { %s17_s19 = sshll.u32 %s632_s18, 4  ;;  %p585_p0 = scmp.ne.s32.totalorder %s855_s0, %s584_s22  ;;  %s18_s19 = int_to_ptr.vmem [resolvable:$true] %s17_s19 }
   0x3   :  { %p588_p1 = scmp.lt.u32.totalorder %s584_s22, %s855_s0 }
   0x5   :  { %p590_p2 = pnand %p588_p1, %p585_p0 }
   0x7   :  { %593 = shalt.err (!%p590_p2)
}
   0x8   :  { %s594_s27 = scalar_lea.vmem %s18_s19, 2048  ;;  %p599_p4 = scmp.lt.s32.totalorder %s18_s19, %s18_s19 }
   0x9   :  { %p595_p3 = scmp.ne.s32.totalorder %s18_s19, %s594_s27  ;;  %p600_p5 = scmp.lt.s32.totalorder %s594_s27, %s594_s27 }
   0xb   :  { %p601_p6 = por %p600_p5, %p599_p4 }
   0xd   :  { %p602_p7 = pnand %p601_p6, %p595_p3 }
   0xf   :  { %605 = shalt.err (!%p602_p7)
}
  0x10   :  { %s633_s28 = smov 128   ;;  %s634_s29 = smov 8  }
  0x11   :  { %23 = dma.hbm_to_vmem [thread:$0]  %s855_s0, 2048, %s18_s19, [#allocation3], %s633_s28, %s633_s28, %s634_s29  }
  0x12   :  { %628 = dma.done.wait [#allocation3], 2048  }
  0x13   :  { %629 = vsyncadd [#allocation3], 4294965248  ;;  %vm51_vm0 = vcmask 523264   ;;  %v685_v0 = vld [vmem:[#allocation2 + $0x40] sm:$0xff]  ;;  %v689_v2 = vld [vmem:[#allocation2 + $0x48] sm:$0xff]  ;;  %v635_v35 = vmov 0.0|0.0   ;;  %v131_v50 = vlaneseq }
  0x14   :  { %v687_v1 = vld [vmem:[#allocation2] sm:$0xff]  ;;  %v76_v3 = vsel %vm51_vm0, %v685_v0, 0.0  ;;  %v695_v5 = vld [vmem:[#allocation2 + $0x8] sm:$0xff]  ;;  %v79_v6 = vsel %vm51_vm0, %v689_v2, 0.0  ;;  %v701_v8 = vld [vmem:[#allocation2 + $0x50] sm:$0xff]  ;;  %556 = vmatprep.subr.bf16.mxu0 %v635_v35  ;;  %568 = vmatprep.subr.bf16.mxu1 %v635_v35  ;;  %vm636_vm1 = vmmov 0  }
  0x15   :  { %v52_v4 = vsel %vm51_vm0, %v687_v1, 0.0  ;;  %77 = vadd.xlane.f32.xlu1 %v76_v3  ;;  %v55_v7 = vsel %vm51_vm0, %v695_v5, 0.0  ;;  %v703_v9 = vld [vmem:[#allocation2 + $0x10] sm:$0xff]  ;;  %v82_v10 = vsel %vm51_vm0, %v701_v8, 0.0  ;;  %v709_v12 = vld [vmem:[#allocation2 + $0x58] sm:$0xff]  ;;  %v717_v16 = vld [vmem:[#allocation2 + $0x60] sm:$0xff] }
  0x16   :  { %53 = vadd.xlane.f32.xlu0 %v52_v4  ;;  %v58_v11 = vsel %vm51_vm0, %v703_v9, 0.0  ;;  %v711_v13 = vld [vmem:[#allocation2 + $0x18] sm:$0xff]  ;;  %v85_v14 = vsel %vm51_vm0, %v709_v12, 0.0  ;;  %v719_v17 = vld [vmem:[#allocation2 + $0x20] sm:$0xff]  ;;  %v88_v18 = vsel %vm51_vm0, %v717_v16, 0.0  ;;  %v725_v20 = vld [vmem:[#allocation2 + $0x68] sm:$0xff] }
  0x17   :  { %v61_v15 = vsel %vm51_vm0, %v711_v13, 0.0  ;;  %v64_v19 = vsel %vm51_vm0, %v719_v17, 0.0  ;;  %v727_v21 = vld [vmem:[#allocation2 + $0x28] sm:$0xff]  ;;  %v91_v22 = vsel %vm51_vm0, %v725_v20, 0.0  ;;  %v733_v24 = vld [vmem:[#allocation2 + $0x70] sm:$0xff]  ;;  %v741_v28 = vld [vmem:[#allocation2 + $0x78] sm:$0xff] }
  0x18   :  { %v67_v23 = vsel %vm51_vm0, %v727_v21, 0.0  ;;  %v735_v25 = vld [vmem:[#allocation2 + $0x30] sm:$0xff]  ;;  %v94_v26 = vsel %vm51_vm0, %v733_v24, 0.0  ;;  %v743_v29 = vld [vmem:[#allocation2 + $0x38] sm:$0xff]  ;;  %v97_v30 = vsel %vm51_vm0, %v741_v28, 0.0  ;;  %v100_v32 = vld [vmem:[%s856_s1] sm:$0xff] }
  0x19   :  { %80 = vadd.xlane.f32.xlu1 %v79_v6  ;;  %v70_v27 = vsel %vm51_vm0, %v735_v25, 0.0  ;;  %v73_v31 = vsel %vm51_vm0, %v743_v29, 0.0  ;;  %v101_v33 = vld [vmem:[%s856_s1 + $0x8] sm:$0xff]  ;;  %v102_v36 = vld [vmem:[%s856_s1 + $0x10] sm:$0xff]  ;;  %v103_v37 = vld [vmem:[%s856_s1 + $0x18] sm:$0xff]  ;;  %v637_v45 = vmov 0.0  }
  0x1a   :  { %56 = vadd.xlane.f32.xlu0 %v55_v7  ;;  %v557_v34 = vpack.c.bf16 %v101_v33, %v100_v32  ;;  %v560_v38 = vpack.c.bf16 %v103_v37, %v102_v36  ;;  %v104_v39 = vld [vmem:[%s856_s1 + $0x20] sm:$0xff]  ;;  %v105_v40 = vld [vmem:[%s856_s1 + $0x28] sm:$0xff]  ;;  %v106_v42 = vld [vmem:[%s856_s1 + $0x30] sm:$0xff]  ;;  %546 = vmatprep.mubr.msk.f32.mxu0 %vm636_vm1, %v637_v45  ;;  %v132_v53 = vand.u32 127, %v131_v50  ;;  %v773_v58 = vshrl.u32 %v131_v50, 7 }
  0x1b   :  { %v563_v41 = vpack.c.bf16 %v105_v40, %v104_v39  ;;  %v107_v43 = vld [vmem:[%s856_s1 + $0x38] sm:$0xff]  ;;  %553 = vmatprep.mubr.msk.f32.mxu1 %vm636_vm1, %v637_v45  ;;  %vm142_vm2 = vcmask 130112   ;;  %vm149_vm3 = vcmask 195712   ;;  %vm156_vm4 = vcmask 261312  }
  0x1c   :  { %558 = vmatpush3.bf16.msra.mxu0 %v557_v34  ;;  %v566_v44 = vpack.c.bf16 %v107_v43, %v106_v42  ;;  %v137_v56 = vadd.s32 4294967288, %v132_v53  ;;  %v144_v57 = vadd.s32 4294967280, %v132_v53  ;;  %v151_v59 = vadd.s32 4294967272, %v132_v53 }
  0x1d   :  { %83 = vadd.xlane.f32.xlu1 %v82_v10  ;;  %559 = vmatprep.subr.bf16.mxu0 %v635_v35  ;;  %v158_v60 = vadd.s32 4294967264, %v132_v53  ;;  %v165_v3 = vadd.s32 4294967256, %v132_v53  ;;  %v172_v6 = vadd.s32 4294967248, %v132_v53  ;;  %v135_v7 = vsub.s32 %v132_v53, %v773_v58 }
  0x1e   :  { %59 = vadd.xlane.f32.xlu0 %v58_v11  ;;  %v140_v63 = vsub.s32 %v137_v56, %v773_v58  ;;  %v147_v4 = vsub.s32 %v144_v57, %v773_v58  ;;  %v154_v10 = vsub.s32 %v151_v59, %v773_v58  ;;  %vm163_vm5 = vcmask 326912  }
  0x1f   :  { %v161_v11 = vsub.s32 %v158_v60, %v773_v58  ;;  %vm170_vm6 = vcmask 392512   ;;  %vm177_vm7 = vcmask 458112   ;;  %vm184_vm8 = vcmask 523712  }
  0x20   :  { %561 = vmatpush3.bf16.msra.mxu0 %v560_v38  ;;  %vm225_vm9 = vcmask 1041409   ;;  %vm313_vm10 = vcmask 1043456   ;;  %vm638_vm11 = vmmov 1   ;;  %vm309_vm13 = vcmask 97280  }
  0x21   :  { %86 = vadd.xlane.f32.xlu1 %v85_v14  ;;  %562 = vmatprep.subr.bf16.mxu0 %v635_v35  ;;  %vm570_vm12 = vmpackc.low %vm313_vm10, %vm638_vm11 }
  0x22   :  { %62 = vadd.xlane.f32.xlu0 %v61_v15 }
  0x24   :  { %564 = vmatpush3.bf16.msra.mxu0 %v563_v41 }
  0x25   :  { %89 = vadd.xlane.f32.xlu1 %v88_v18  ;;  %565 = vmatprep.subr.bf16.mxu0 %v635_v35  ;;  %v179_v18 = vadd.s32 4294967240, %v132_v53 }
  0x26   :  { %65 = vadd.xlane.f32.xlu0 %v64_v19 }
  0x27   :  { %v182_v39 = vsub.s32 %v179_v18, %v773_v58  ;;  %v514_v18 = vld [vmem:[%s859_s4] ss:$0 sm:$0xff] }
  0x28   :  { %567 = vmatpush3.bf16.msra.mxu0 %v566_v44 }
  0x29   :  { %92 = vadd.xlane.f32.xlu1 %v91_v22 }
  0x2a   :  { %68 = vadd.xlane.f32.xlu0 %v67_v23  ;;  %v168_v23 = vsub.s32 %v165_v3, %v773_v58  ;;  %v300_v3 = vld [vmem:[%s858_s3] sm:$0xff] }
  0x2d   :  { %95 = vadd.xlane.f32.xlu1 %v94_v26 }
  0x2e   :  { %71 = vadd.xlane.f32.xlu0 %v70_v27 }
  0x31   :  { %98 = vadd.xlane.f32.xlu1 %v97_v30  ;;  %v175_v30 = vsub.s32 %v172_v6, %v773_v58 }
  0x32   :  { %74 = vadd.xlane.f32.xlu0 %v73_v31 }
  0xa2   :  { %v78_v46 = vpop.xlane.xlu1 %77 }
  0xa3   :  { %v54_v47 = vpop.xlane.xlu0 %53  ;;  %v189_v31 = vrot.slane %v78_v46, %v135_v7 }
  0xa4   :  { %v136_v32 = vrot.slane %v54_v47, %v135_v7  ;;  %v512_v7 = vld [vmem:[%s857_s2] ss:$0 sm:$0xff]  ;;  %s639_s2 = smov [#allocation5]  }
  0xa6   :  { %v81_v48 = vpop.xlane.xlu1 %80 }
  0xa7   :  { %v57_v49 = vpop.xlane.xlu0 %56  ;;  %v193_v19 = vrot.slane %v81_v48, %v140_v63 }
  0xa8   :  { %v141_v22 = vrot.slane %v57_v49, %v140_v63 }
  0xa9   :  { %v194_v40 = vsel %vm142_vm2, %v193_v19, %v189_v31  ;;  %v395_v31 = vsub.s32 0, %v773_v58 }
  0xaa   :  { %v84_v51 = vpop.xlane.xlu1 %83  ;;  %v143_v41 = vsel %vm142_vm2, %v141_v22, %v136_v32 }
  0xab   :  { %v60_v52 = vpop.xlane.xlu0 %59  ;;  %v198_v26 = vrot.slane %v84_v51, %v147_v4 }
  0xac   :  { %v148_v27 = vrot.slane %v60_v52, %v147_v4  ;;  %v301_v4 = vld [vmem:[%s858_s3 + $0x8] sm:$0xf]  ;;  %s500_s3 = sshll.u32 %s639_s2, 4  ;;  %s501_s3 = int_to_ptr.vmem [resolvable:$true] %s500_s3 }
  0xad   :  { %v199_v44 = vsel %vm149_vm3, %v198_v26, %v194_v40  ;;  %v569_v6 = vpack.c.bf16 %v301_v4, %v300_v3  ;;  %s606_s4 = scalar_lea.vmem %s501_s3, 2048  ;;  %p611_p9 = scmp.lt.s32.totalorder %s501_s3, %s501_s3 }
  0xae   :  { %v87_v54 = vpop.xlane.xlu1 %86  ;;  %v150_v45 = vsel %vm149_vm3, %v148_v27, %v143_v41  ;;  %p607_p8 = scmp.ne.s32.totalorder %s501_s3, %s606_s4  ;;  %p612_p10 = scmp.lt.s32.totalorder %s606_s4, %s606_s4 }
  0xaf   :  { %v63_v55 = vpop.xlane.xlu0 %62  ;;  %v203_v33 = vrot.slane %v87_v54, %v154_v10  ;;  %571 = vmatpush3.bf16.msk.msra.mxu1 %vm570_vm12, %v569_v6 }
  0xb0   :  { %v155_v34 = vrot.slane %v63_v55, %v154_v10  ;;  %p613_p11 = por %p612_p10, %p611_p9 }
  0xb1   :  { %v204_v48 = vsel %vm156_vm4, %v203_v33, %v199_v44 }
  0xb2   :  { %v90_v61 = vpop.xlane.xlu1 %89  ;;  %v157_v49 = vsel %vm156_vm4, %v155_v34, %v150_v45  ;;  %v430_v34 = vsub.s32 1, %v773_v58  ;;  %p614_p12 = pnand %p613_p11, %p607_p8 }
  0xb3   :  { %v66_v62 = vpop.xlane.xlu0 %65  ;;  %v208_v35 = vrot.slane %v90_v61, %v161_v11 }
  0xb4   :  { %v162_v36 = vrot.slane %v66_v62, %v161_v11 }
  0xb5   :  { %v209_v50 = vsel %vm163_vm5, %v208_v35, %v204_v48 }
  0xb6   :  { %v93_v14 = vpop.xlane.xlu1 %92  ;;  %v164_v51 = vsel %vm163_vm5, %v162_v36, %v157_v49 }
  0xb7   :  { %v69_v15 = vpop.xlane.xlu0 %68  ;;  %v213_v42 = vrot.slane %v93_v14, %v168_v23 }
  0xb8   :  { %v169_v43 = vrot.slane %v69_v15, %v168_v23 }
  0xb9   :  { %v214_v54 = vsel %vm170_vm6, %v213_v42, %v209_v50 }
  0xba   :  { %v96_v37 = vpop.xlane.xlu1 %95  ;;  %v171_v55 = vsel %vm170_vm6, %v169_v43, %v164_v51 }
  0xbb   :  { %v72_v38 = vpop.xlane.xlu0 %71  ;;  %v218_v46 = vrot.slane %v96_v37, %v175_v30 }
  0xbc   :  { %v176_v47 = vrot.slane %v72_v38, %v175_v30 }
  0xbd   :  { %v219_v59 = vsel %vm177_vm7, %v218_v46, %v214_v54 }
  0xbe   :  { %v99_v52 = vpop.xlane.xlu1 %98  ;;  %v178_v60 = vsel %vm177_vm7, %v176_v47, %v171_v55 }
  0xbf   :  { %v75_v53 = vpop.xlane.xlu0 %74  ;;  %v223_v56 = vrot.slane %v99_v52, %v182_v39 }
  0xc0   :  { %v183_v57 = vrot.slane %v75_v53, %v182_v39 }
  0xc1   :  { %v224_v61 = vsel %vm184_vm8, %v223_v56, %v219_v59 }
  0xc2   :  { %v185_v62 = vsel %vm184_vm8, %v183_v57, %v178_v60 }
  0xc3   :  { %v226_v63 = vsel %vm225_vm9, %v224_v61, %v185_v62 }
  0xc4   :  { %547 = vmatmul.mubr.msk.f32.vlgmr.msra.gmra.mrb[0].mxu0 %vm51_vm0, %v226_v63 }
 0x197   :  { %v295_v10 = vpop.f32.mrb[0].mxu0 }
 0x198   :  { %v296_v11 = vadd.f32 %v512_v7, %v295_v10  ;;  %v548_v14 = vpop.f32.mrb[1].mxu0 }
 0x19a   :  { %v299_v15 = vmax.f32 %v296_v11, 0.0 }
 0x19c   :  { %554 = vmatmul.mubr.msk.f32.vlgmr.msra.gmra.mrb[0].mxu1 %vm309_vm13, %v299_v15 }
 0x26f   :  { %v383_v19 = vpop.f32.mrb[0].mxu1 }
 0x270   :  { %v384_v22 = vadd.f32 %v514_v18, %v383_v19  ;;  %v555_v23 = vpop.f32.mrb[1].mxu1 }
 0x272   :  { %v517_v26 = vmul.f32 -1.442695, %v384_v22 }
 0x274   :  { %580 = vpow2.f32 %v517_v26 }
 0x27e   :  { %v581_v27 = vpop.eup %580 }
 0x27f   :  { %v390_v30 = vadd.f32 1.0, %v581_v27 }
 0x281   :  { %582 = vrcp.f32 %v390_v30 }
 0x28b   :  { %v583_v32 = vpop.eup %582 }
 0x28c   :  { %v396_v33 = vrot.slane %v583_v32, %v395_v31  ;;  %v431_v35 = vrot.slane %v583_v32, %v430_v34 }
 0x28e   :  { %402 = vbcast.lane.b32.xlu1 %v396_v33, 264  ;;  %398 = vbcast.lane.b32.xlu0 %v396_v33, 256 }
 0x292   :  { %406 = vbcast.lane.b32.xlu1 %v396_v33, 272  ;;  %414 = vbcast.lane.b32.xlu0 %v396_v33, 288 }
 0x296   :  { %410 = vbcast.lane.b32.xlu1 %v396_v33, 280  ;;  %422 = vbcast.lane.b32.xlu0 %v396_v33, 304 }
 0x29a   :  { %418 = vbcast.lane.b32.xlu1 %v396_v33, 296  ;;  %433 = vbcast.lane.b32.xlu0 %v431_v35, 256 }
 0x29e   :  { %426 = vbcast.lane.b32.xlu1 %v396_v33, 312  ;;  %441 = vbcast.lane.b32.xlu0 %v431_v35, 272 }
 0x2a2   :  { %437 = vbcast.lane.b32.xlu1 %v431_v35, 264  ;;  %449 = vbcast.lane.b32.xlu0 %v431_v35, 288 }
 0x2a6   :  { %445 = vbcast.lane.b32.xlu1 %v431_v35, 280  ;;  %457 = vbcast.lane.b32.xlu0 %v431_v35, 304 }
 0x2aa   :  { %453 = vbcast.lane.b32.xlu1 %v431_v35, 296 }
 0x2ae   :  { %461 = vbcast.lane.b32.xlu1 %v431_v35, 312 }
 0x300   :  { %v403_v36 = vpop.permute.xlu1 %402  ;;  %v399_v37 = vpop.permute.xlu0 %398 }
 0x301   :  { %v464_v38 = vmul.f32 %v403_v36, %v695_v5  ;;  %v463_v39 = vmul.f32 %v399_v37, %v687_v1 }
 0x303   :  { %480 = vst.msk [vmem:[#allocation5 + $0x8] sm:$0xff] %vm51_vm0, %v464_v38  ;;  %479 = vst.msk [vmem:[#allocation5] sm:$0xff] %vm51_vm0, %v463_v39 }
 0x304   :  { %v407_v58 = vpop.permute.xlu1 %406  ;;  %v415_v40 = vpop.permute.xlu0 %414 }
 0x305   :  { %v465_v41 = vmul.f32 %v407_v58, %v703_v9  ;;  %v467_v42 = vmul.f32 %v415_v40, %v719_v17 }
 0x307   :  { %481 = vst.msk [vmem:[#allocation5 + $0x10] sm:$0xff] %vm51_vm0, %v465_v41  ;;  %483 = vst.msk [vmem:[#allocation5 + $0x20] sm:$0xff] %vm51_vm0, %v467_v42 }
 0x308   :  { %v411_v43 = vpop.permute.xlu1 %410  ;;  %v423_v44 = vpop.permute.xlu0 %422 }
 0x309   :  { %v466_v5 = vmul.f32 %v411_v43, %v711_v13  ;;  %v469_v1 = vmul.f32 %v423_v44, %v735_v25 }
 0x30b   :  { %482 = vst.msk [vmem:[#allocation5 + $0x18] sm:$0xff] %vm51_vm0, %v466_v5  ;;  %485 = vst.msk [vmem:[#allocation5 + $0x30] sm:$0xff] %vm51_vm0, %v469_v1 }
 0x30c   :  { %v419_v45 = vpop.permute.xlu1 %418  ;;  %v434_v46 = vpop.permute.xlu0 %433 }
 0x30d   :  { %v468_v9 = vmul.f32 %v419_v45, %v727_v21  ;;  %v471_v17 = vmul.f32 %v434_v46, %v685_v0 }
 0x30f   :  { %484 = vst.msk [vmem:[#allocation5 + $0x28] sm:$0xff] %vm51_vm0, %v468_v9  ;;  %487 = vst.msk [vmem:[#allocation5 + $0x40] sm:$0xff] %vm51_vm0, %v471_v17 }
 0x310   :  { %v427_v47 = vpop.permute.xlu1 %426  ;;  %v442_v48 = vpop.permute.xlu0 %441 }
 0x311   :  { %v470_v13 = vmul.f32 %v427_v47, %v743_v29  ;;  %v473_v25 = vmul.f32 %v442_v48, %v701_v8 }
 0x313   :  { %486 = vst.msk [vmem:[#allocation5 + $0x38] sm:$0xff] %vm51_vm0, %v470_v13  ;;  %489 = vst.msk [vmem:[#allocation5 + $0x50] sm:$0xff] %vm51_vm0, %v473_v25 }
 0x314   :  { %v438_v49 = vpop.permute.xlu1 %437  ;;  %v450_v50 = vpop.permute.xlu0 %449 }
 0x315   :  { %v472_v21 = vmul.f32 %v438_v49, %v689_v2  ;;  %v475_v0 = vmul.f32 %v450_v50, %v717_v16 }
 0x317   :  { %488 = vst.msk [vmem:[#allocation5 + $0x48] sm:$0xff] %vm51_vm0, %v472_v21  ;;  %491 = vst.msk [vmem:[#allocation5 + $0x60] sm:$0xff] %vm51_vm0, %v475_v0 }
 0x318   :  { %v446_v51 = vpop.permute.xlu1 %445  ;;  %v458_v52 = vpop.permute.xlu0 %457 }
 0x319   :  { %v474_v29 = vmul.f32 %v446_v51, %v709_v12  ;;  %v477_v8 = vmul.f32 %v458_v52, %v733_v24 }
 0x31b   :  { %490 = vst.msk [vmem:[#allocation5 + $0x58] sm:$0xff] %vm51_vm0, %v474_v29  ;;  %493 = vst.msk [vmem:[#allocation5 + $0x70] sm:$0xff] %vm51_vm0, %v477_v8 }
 0x31c   :  { %v454_v53 = vpop.permute.xlu1 %453 }
 0x31d   :  { %v476_v54 = vmul.f32 %v454_v53, %v725_v20 }
 0x31f   :  { %492 = vst.msk [vmem:[#allocation5 + $0x68] sm:$0xff] %vm51_vm0, %v476_v54 }
 0x320   :  { %v462_v2 = vpop.permute.xlu1 %461 }
 0x321   :  { %v478_v16 = vmul.f32 %v462_v2, %v741_v28 }
 0x323   :  { %494 = vst.msk [vmem:[#allocation5 + $0x78] sm:$0xff] %vm51_vm0, %v478_v16 }
 0x324   :  { %617 = shalt.err (!%p614_p12)
}
 0x325   :  { %s618_s7 = scalar_lea.hbm %s860_s5, 2048 }
 0x326   :  { %p619_p13 = scmp.ne.s32.totalorder %s860_s5, %s618_s7  ;;  %p622_p0 = scmp.lt.u32.totalorder %s618_s7, %s860_s5 }
 0x328   :  { %p624_p1 = pnand %p622_p0, %p619_p13 }
 0x32a   :  { %627 = shalt.err (!%p624_p1)
}
 0x32b   :  { %506 = dma.vmem_to_hbm [thread:$0]  %s501_s3, 2048, %s860_s5, [#allocation4], %s633_s28, %s633_s28, %s634_s29  }
 0x32c   :  { %630 = dma.done.wait [#allocation4], 2048  }
 0x32d   :  { %631 = vsyncadd [#allocation4], 4294965248 }
 0x32e   :  { %510 = vsyncpa [#allocation3], 1 }
 0x32f   :  { %511 = vsyncpa [#allocation4], 1 }

</bundles_post_ra>
